<compile_context>
chip_gen: v5e
topology: v5e:2x2
jax: 0.10.0
libtpu: 0.0.40
codegen_flags: <defaults>
</compile_context>

<pallas_src>
import jax
import jax.numpy as jnp
from jax import lax
from jax.experimental import pallas as pl
from jax.experimental.pallas import tpu as pltpu


def _round_up(x: int, m: int) -> int:
    return ((x + m - 1) // m) * m


def _head_kernel(x_ref, w_ref, b_ref, o_ref, acc_ref):
    # x_ref: (tm, tk), w_ref: (tn, tk), b_ref: (1, tn), o_ref: (tm, tn)
    k = pl.program_id(2)

    @pl.when(k == 0)
    def _():
        acc_ref[...] = jnp.zeros_like(acc_ref)

    # x @ W^T : contract last dim of x with last dim of w (MXU consumes the
    # transposed operand natively; no wrapper-side weight.T needed).
    acc_ref[...] += lax.dot_general(
        x_ref[...], w_ref[...],
        dimension_numbers=(((1,), (1,)), ((), ())),
        preferred_element_type=jnp.float32,
    )

    @pl.when(k == pl.num_programs(2) - 1)
    def _():
        out = acc_ref[...] + b_ref[...].astype(jnp.float32)
        o_ref[...] = out.astype(o_ref.dtype)


def flatten_head_forward(x, weight, bias):
    """
    x:      [B, F, S, D]      float32
    weight: [pred_len, S*D]   (PyTorch nn.Linear layout, NOT pre-transposed)
    bias:   [pred_len]
    returns: [B, pred_len, F]
    """
    B, F, S, D = x.shape
    N = weight.shape[0]          # pred_len
    K = S * D
    M = B * F

    # ---- tile sizes (lane/sublane aligned, capped for VMEM) -----------------
    tn = min(256, _round_up(N, 128))
    tk = min(512, _round_up(K, 128))
    tm = min(256, _round_up(M, 8))

    N_pad = _round_up(N, tn)
    K_pad = _round_up(K, tk)
    M_pad = _round_up(M, tm)

    gm, gn, gk = M_pad // tm, N_pad // tn, K_pad // tk

    # ---- zero-pad operands to tile multiples (no-op when already aligned) --
    x_flat = x.reshape(M, K)
    x_p = jnp.pad(x_flat, ((0, M_pad - M), (0, K_pad - K)))
    w_p = jnp.pad(weight, ((0, N_pad - N), (0, K_pad - K)))     # [N_pad, K_pad]
    b_p = jnp.pad(bias, (0, N_pad - N)).reshape(1, N_pad)       # [1, N_pad]

    # ---- VMEM budget / cost hints ------------------------------------------
    bytes_per = 4
    tile_bytes = bytes_per * (2 * (tm * tk + tn * tk + tm * tn + tn) + tm * tn)
    vmem_limit = min(32 * 1024 * 1024, max(16 * 1024 * 1024, 2 * tile_bytes))

    cost = pl.CostEstimate(
        flops=2 * M_pad * K_pad * N_pad,
        transcendentals=0,
        bytes_accessed=bytes_per * (M_pad * K_pad + N_pad * K_pad
                                    + M_pad * N_pad + N_pad),
    )

    out = pl.pallas_call(
        _head_kernel,
        out_shape=jax.ShapeDtypeStruct((M_pad, N_pad), x.dtype),
        grid_spec=pltpu.PrefetchScalarGridSpec(
            num_scalar_prefetch=0,
            grid=(gm, gn, gk),
            in_specs=[
                pl.BlockSpec((tm, tk), lambda i, j, k: (i, k)),   # X tile
                pl.BlockSpec((tn, tk), lambda i, j, k: (j, k)),   # W tile ([N,K])
                pl.BlockSpec((1, tn), lambda i, j, k: (0, j)),    # bias tile
            ],
            out_specs=pl.BlockSpec((tm, tn), lambda i, j, k: (i, j)),
            scratch_shapes=[pltpu.VMEM((tm, tn), jnp.float32)],
        ),
        compiler_params=pltpu.CompilerParams(
            dimension_semantics=("parallel", "parallel", "arbitrary"),
            vmem_limit_bytes=vmem_limit,
        ),
        cost_estimate=cost,
    )(x_p, w_p, b_p)

    # Strip padding, restore [B, F, pred_len], then permute(0, 2, 1).
    out = out[:M, :N].reshape(B, F, N)
    # Dropout: identity in eval mode (no-op).
    # Final transpose stays in XLA: F is tiny, a fused transposed write would
    # be lane-sparse (masked stores) and lose more than it saves.
    return jnp.transpose(out, (0, 2, 1))


if __name__ == "__main__":
    # Small, module-consistent shapes.
    B, F, S, D = 2, 4, 8, 32        # batch, num_features, seq_len, d_model
    pred_len = 16

    key = jax.random.PRNGKey(0)
    kx, kw, kb = jax.random.split(key, 3)

    x = jax.random.normal(kx, (B, F, S, D), dtype=jnp.float32)
    # Deterministic synthetic parameters: nn.Linear(seq_len*d_model, pred_len).
    weight = jax.random.normal(kw, (pred_len, S * D), dtype=jnp.float32) * 0.02
    bias = jax.random.normal(kb, (pred_len,), dtype=jnp.float32) * 0.02

    y = flatten_head_forward(x, weight, bias)
    y = jax.block_until_ready(y)

    # Pure-JAX reference.
    ref = jnp.einsum("bfk,nk->bnf", x.reshape(B, F, S * D), weight) \
        + bias[None, :, None]
    assert y.shape == (B, pred_len, F)
    assert jnp.allclose(y, ref, atol=1e-4, rtol=1e-4)

    print("KERNEL_OK")
</pallas_src>

<mosaic_0001>
module attributes {stable_mosaic.version = 11 : i64} {
  func.func @_head_kernel(%arg0: i32, %arg1: i32, %arg2: i32, %arg3: memref<8x256xf32, #tpu.memory_space<vmem>>, %arg4: memref<128x256xf32, #tpu.memory_space<vmem>>, %arg5: memref<1x128xf32, #tpu.memory_space<vmem>>, %arg6: memref<8x128xf32, #tpu.memory_space<vmem>>, %arg7: memref<8x128xf32, #tpu.memory_space<vmem>>) attributes {dimension_semantics = [#tpu.dimension_semantics<parallel>, #tpu.dimension_semantics<parallel>, #tpu.dimension_semantics<arbitrary>], iteration_bounds = array<i64: 1, 1, 1>, scalar_prefetch = 0 : i64, scratch_operands = 1 : i64, tpu.core_type = #tpu.core_type<tc>, window_params = [{transform_indices = @transform_0, window_bounds = array<i64: 8, 256>}, {transform_indices = @transform_1, window_bounds = array<i64: 128, 256>}, {transform_indices = @transform_2, window_bounds = array<i64: 1, 128>}, {transform_indices = @transform_3, window_bounds = array<i64: 8, 128>}]} {
    %c0_i32 = arith.constant 0 : i32
    %0 = arith.cmpi eq, %arg2, %c0_i32 : i32
    %1 = arith.extui %0 : i1 to i32
    %c0_i32_0 = arith.constant 0 : i32
    %2 = arith.cmpi ne, %1, %c0_i32_0 : i32
    scf.if %2 {
      %cst_10 = arith.constant 0.000000e+00 : f32
      %12 = vector.broadcast %cst_10 : f32 to vector<8x128xf32>
      %c0_11 = arith.constant 0 : index
      %c0_12 = arith.constant 0 : index
      %13 = vector.load %arg7[%c0_11, %c0_12] : memref<8x128xf32, #tpu.memory_space<vmem>>, vector<8x128xf32>
      tpu.vector_store %arg7[%c0_11, %c0_12], %12 {strides = array<i32>} : memref<8x128xf32, #tpu.memory_space<vmem>>, vector<8x128xf32>,
    } else {
    }
    %c0 = arith.constant 0 : index
    %c0_1 = arith.constant 0 : index
    %3 = vector.load %arg7[%c0, %c0_1] : memref<8x128xf32, #tpu.memory_space<vmem>>, vector<8x128xf32>
    %c0_2 = arith.constant 0 : index
    %c0_3 = arith.constant 0 : index
    %4 = vector.load %arg3[%c0_2, %c0_3] : memref<8x256xf32, #tpu.memory_space<vmem>>, vector<8x256xf32>
    %c0_4 = arith.constant 0 : index
    %c0_5 = arith.constant 0 : index
    %5 = vector.load %arg4[%c0_4, %c0_5] : memref<128x256xf32, #tpu.memory_space<vmem>>, vector<128x256xf32>
    %cst = arith.constant dense<0.000000e+00> : vector<8x128xf32>
    %6 = tpu.matmul %4, %5, %cst {dimension_numbers = #tpu.dot_dimension_numbers<[1], [1], [0], [0], [0, 0, 1, 0], [], []>} : vector<8x256xf32>, vector<128x256xf32>, vector<8x128xf32> -> vector<8x128xf32>
    %7 = arith.addf %3, %6 : vector<8x128xf32>
    %c0_6 = arith.constant 0 : index
    %c0_7 = arith.constant 0 : index
    %8 = vector.load %arg7[%c0_6, %c0_7] : memref<8x128xf32, #tpu.memory_space<vmem>>, vector<8x128xf32>
    tpu.vector_store %arg7[%c0_6, %c0_7], %7 {strides = array<i32>} : memref<8x128xf32, #tpu.memory_space<vmem>>, vector<8x128xf32>,
    %c0_i32_8 = arith.constant 0 : i32
    %9 = arith.cmpi eq, %arg2, %c0_i32_8 : i32
    %10 = arith.extui %9 : i1 to i32
    %c0_i32_9 = arith.constant 0 : i32
    %11 = arith.cmpi ne, %10, %c0_i32_9 : i32
    scf.if %11 {
      %c0_10 = arith.constant 0 : index
      %c0_11 = arith.constant 0 : index
      %12 = vector.load %arg7[%c0_10, %c0_11] : memref<8x128xf32, #tpu.memory_space<vmem>>, vector<8x128xf32>
      %c0_12 = arith.constant 0 : index
      %c0_13 = arith.constant 0 : index
      %13 = vector.load %arg5[%c0_12, %c0_13] : memref<1x128xf32, #tpu.memory_space<vmem>>, vector<1x128xf32>
      %14 = vector.broadcast %13 : vector<1x128xf32> to vector<8x128xf32>
      %15 = arith.addf %12, %14 : vector<8x128xf32>
      %c0_14 = arith.constant 0 : index
      %c0_15 = arith.constant 0 : index
      %16 = vector.load %arg6[%c0_14, %c0_15] : memref<8x128xf32, #tpu.memory_space<vmem>>, vector<8x128xf32>
      tpu.vector_store %arg6[%c0_14, %c0_15], %15 {strides = array<i32>} : memref<8x128xf32, #tpu.memory_space<vmem>>, vector<8x128xf32>,
    } else {
    }
    return
  }
  func.func @transform_0(%arg0: i32, %arg1: i32, %arg2: i32) -> (i32, i32) {
    %c0_i32 = arith.constant 0 : i32
    return %arg0, %arg2 : i32, i32
  }
  func.func @transform_1(%arg0: i32, %arg1: i32, %arg2: i32) -> (i32, i32) {
    %c0_i32 = arith.constant 0 : i32
    return %arg1, %arg2 : i32, i32
  }
  func.func @transform_2(%arg0: i32, %arg1: i32, %arg2: i32) -> (i32, i32) {
    %c0_i32 = arith.constant 0 : i32
    %c0_i32_0 = arith.constant 0 : i32
    return %c0_i32, %arg1 : i32, i32
  }
  func.func @transform_3(%arg0: i32, %arg1: i32, %arg2: i32) -> (i32, i32) {
    %c0_i32 = arith.constant 0 : i32
    return %arg0, %arg1 : i32, i32
  }
}

</mosaic_0001>

<bundles_post_ra>
// kernel: tpu_custom_call.1
= control target key start
LH: loop header
LB: loop body
LE: loop exit
PB: predicated region body
PF: predicated region fallthrough
CT: control target
= control target key end

     0   :  { %8 = vsyncpa [#allocation4], 0  ;;  %s276_s0 = inlined_call_operand.hbm [shape: f32[8,256], index: 0, kind: input, shape index: {}]   ;;  %s277_s1 = inlined_call_operand.hbm [shape: f32[128,256], index: 1, kind: input, shape index: {}]   ;;  %s278_s2 = inlined_call_operand.vmem [shape: f32[1,128], index: 2, kind: input, shape index: {}]   ;;  %s279_s3 = inlined_call_operand.hbm [shape: f32[8,128], index: 3, kind: output, shape index: {}]  }
   0x1   :  { %9 = vsyncpa [#allocation7], 0 }
   0x2   :  { %10 = vsyncpa [#allocation5], 0  ;;  %s16_s14 = sshll.u32 %s276_s0, 4  ;;  %s239_s15 = smov [#allocation3]   ;;  %s17_s14 = int_to_ptr.hbm [resolvable:$true] %s16_s14 }
   0x3   :  { %s18_s16 = sshll.u32 %s239_s15, 4  ;;  %s26_s19 = sshll.u32 %s277_s1, 4  ;;  %s19_s16 = int_to_ptr.vmem [resolvable:$true] %s18_s16  ;;  %s27_s19 = int_to_ptr.hbm [resolvable:$true] %s26_s19 }
   0x4   :  { %21 = dma.hbm_to_vmem [thread:$0]  %s17_s14, 256, %s19_s16, [#allocation4]  }
   0x5   :  { %s240_s20 = smov [#allocation6]   ;;  %s241_s22 = smov 256  }
   0x6   :  { %s28_s21 = sshll.u32 %s240_s20, 4  ;;  %s242_s23 = smov 16   ;;  %s29_s21 = int_to_ptr.vmem [resolvable:$true] %s28_s21 }
   0x7   :  { %34 = dma.hbm_to_vmem [thread:$0]  %s27_s19, 4096, %s29_s21, [#allocation7], %s241_s22, %s241_s22, %s242_s23  }
   0x8   :  { %233 = dma.done.wait [#allocation4], 256  }
   0x9   :  { %234 = vsyncadd [#allocation4], 4294967040 }
   0xa   :  { %235 = dma.done.wait [#allocation7], 4096  }
   0xb   :  { %236 = vsyncadd [#allocation7], 4294963200  ;;  %v83_v0 = vld [vmem:[#allocation6 + $0xf0] sm:$0xff]  ;;  %v84_v1 = vld [vmem:[#allocation6 + $0xf8] sm:$0xff]  ;;  %s243_s24 = smov [#allocation8]   ;;  %s144_s28 = sshll.u32 %s279_s3, 4  ;;  %s145_s28 = int_to_ptr.hbm [resolvable:$true] %s144_s28 }
   0xc   :  { %85 = vmatpush.xpose.msra.mxu0 %v83_v0  ;;  %105 = vmatpush.xpose.msra.mxu1 %v84_v1  ;;  %v81_v2 = vld [vmem:[#allocation6 + $0xe0] sm:$0xff]  ;;  %v82_v3 = vld [vmem:[#allocation6 + $0xe8] sm:$0xff]  ;;  %v79_v4 = vld [vmem:[#allocation6 + $0xd0] sm:$0xff]  ;;  %s142_s25 = sshll.u32 %s243_s24, 4  ;;  %s143_s25 = int_to_ptr.vmem [resolvable:$true] %s142_s25 }
   0xd   :  { %v80_v5 = vld [vmem:[#allocation6 + $0xd8] sm:$0xff]  ;;  %v77_v6 = vld [vmem:[#allocation6 + $0xc0] sm:$0xff]  ;;  %v78_v7 = vld [vmem:[#allocation6 + $0xc8] sm:$0xff] }
   0xe   :  { %v75_v8 = vld [vmem:[#allocation6 + $0xb0] sm:$0xff]  ;;  %v76_v9 = vld [vmem:[#allocation6 + $0xb8] sm:$0xff]  ;;  %v73_v10 = vld [vmem:[#allocation6 + $0xa0] sm:$0xff] }
   0xf   :  { %v74_v11 = vld [vmem:[#allocation6 + $0xa8] sm:$0xff]  ;;  %v71_v12 = vld [vmem:[#allocation6 + $0x90] sm:$0xff]  ;;  %v72_v13 = vld [vmem:[#allocation6 + $0x98] sm:$0xff] }
  0x10   :  { %86 = vmatpush.xpose.msra.mxu0 %v81_v2  ;;  %106 = vmatpush.xpose.msra.mxu1 %v82_v3  ;;  %v69_v14 = vld [vmem:[#allocation6 + $0x80] sm:$0xff]  ;;  %v70_v15 = vld [vmem:[#allocation6 + $0x88] sm:$0xff]  ;;  %v67_v16 = vld [vmem:[#allocation6 + $0x70] sm:$0xff] }
  0x11   :  { %v68_v17 = vld [vmem:[#allocation6 + $0x78] sm:$0xff]  ;;  %v65_v18 = vld [vmem:[#allocation6 + $0x60] sm:$0xff]  ;;  %v66_v19 = vld [vmem:[#allocation6 + $0x68] sm:$0xff] }
  0x12   :  { %v63_v20 = vld [vmem:[#allocation6 + $0x50] sm:$0xff]  ;;  %v64_v21 = vld [vmem:[#allocation6 + $0x58] sm:$0xff]  ;;  %v61_v22 = vld [vmem:[#allocation6 + $0x40] sm:$0xff] }
  0x13   :  { %v62_v23 = vld [vmem:[#allocation6 + $0x48] sm:$0xff]  ;;  %v59_v24 = vld [vmem:[#allocation6 + $0x30] sm:$0xff]  ;;  %v60_v25 = vld [vmem:[#allocation6 + $0x38] sm:$0xff] }
  0x14   :  { %87 = vmatpush.xpose.msra.mxu0 %v79_v4  ;;  %107 = vmatpush.xpose.msra.mxu1 %v80_v5  ;;  %v57_v26 = vld [vmem:[#allocation6 + $0x20] sm:$0xff]  ;;  %v58_v27 = vld [vmem:[#allocation6 + $0x28] sm:$0xff]  ;;  %v55_v28 = vld [vmem:[#allocation6 + $0x10] sm:$0xff] }
  0x15   :  { %v56_v29 = vld [vmem:[#allocation6 + $0x18] sm:$0xff]  ;;  %v53_v30 = vld [vmem:[#allocation6] sm:$0xff]  ;;  %v54_v31 = vld [vmem:[#allocation6 + $0x8] sm:$0xff] }
  0x16   :  { %v51_v32 = vld [vmem:[#allocation3] sm:$0xff]  ;;  %v52_v33 = vld [vmem:[#allocation3 + $0x8] sm:$0xff] }
  0x17   :  { %v160_v34 = vld [vmem:[%s278_s2] ss:$0 sm:$0xff] }
  0x18   :  { %88 = vmatpush.xpose.msra.mxu0 %v77_v6  ;;  %108 = vmatpush.xpose.msra.mxu1 %v78_v7 }
  0x1c   :  { %89 = vmatpush.xpose.msra.mxu0 %v75_v8  ;;  %109 = vmatpush.xpose.msra.mxu1 %v76_v9 }
  0x20   :  { %90 = vmatpush.xpose.msra.mxu0 %v73_v10  ;;  %110 = vmatpush.xpose.msra.mxu1 %v74_v11 }
  0x24   :  { %91 = vmatpush.xpose.msra.mxu0 %v71_v12  ;;  %111 = vmatpush.xpose.msra.mxu1 %v72_v13 }
  0x28   :  { %92 = vmatpush.xpose.msra.mxu0 %v69_v14  ;;  %112 = vmatpush.xpose.msra.mxu1 %v70_v15 }
  0x2c   :  { %93 = vmatpush.xpose.msra.mxu0 %v67_v16  ;;  %113 = vmatpush.xpose.msra.mxu1 %v68_v17 }
  0x30   :  { %94 = vmatpush.xpose.msra.mxu0 %v65_v18  ;;  %114 = vmatpush.xpose.msra.mxu1 %v66_v19 }
  0x34   :  { %95 = vmatpush.xpose.msra.mxu0 %v63_v20  ;;  %115 = vmatpush.xpose.msra.mxu1 %v64_v21 }
  0x38   :  { %96 = vmatpush.xpose.msra.mxu0 %v61_v22  ;;  %116 = vmatpush.xpose.msra.mxu1 %v62_v23 }
  0x3c   :  { %97 = vmatpush.xpose.msra.mxu0 %v59_v24  ;;  %117 = vmatpush.xpose.msra.mxu1 %v60_v25 }
  0x40   :  { %98 = vmatpush.xpose.msra.mxu0 %v57_v26  ;;  %118 = vmatpush.xpose.msra.mxu1 %v58_v27 }
  0x44   :  { %99 = vmatpush.xpose.msra.mxu0 %v55_v28  ;;  %119 = vmatpush.xpose.msra.mxu1 %v56_v29 }
  0x48   :  { %100 = vmatpush.xpose.msra.mxu0 %v53_v30  ;;  %120 = vmatpush.xpose.msra.mxu1 %v54_v31 }
  0x4b   :  { %101 = vmatmul.f32.vlgmr.msra.gmra.mxu0 %v51_v32  ;;  %121 = vmatmul.f32.vlgmr.msra.gmra.mxu1 %v52_v33 }
  0xc8   :  { %v102_v35 = vpop.f32.mrf.mxu0  ;;  %v122_v36 = vpop.f32.mrf.mxu1 }
  0xc9   :  { %v123_v37 = vadd.f32 %v122_v36, %v102_v35 }
  0xcb   :  { %v135_v38 = vadd.f32 %v160_v34, %v123_v37 }
  0xcd   :  { %136 = vst [vmem:[#allocation8] sm:$0xff] %v135_v38 }
  0xce   :  { %147 = dma.vmem_to_hbm [thread:$0]  %s143_s25, 128, %s145_s28, [#allocation5]  }
  0xcf   :  { %237 = dma.done.wait [#allocation5], 128  }
  0xd0   :  { %238 = vsyncadd [#allocation5], 4294967168 }
  0xd1   :  { %152 = vsyncpa [#allocation4], 1 }
  0xd2   :  { %153 = vsyncpa [#allocation7], 1 }
  0xd3   :  { %154 = vsyncpa [#allocation5], 1 }

</bundles_post_ra>
